<compile_context>
chip_gen: v7x
topology: tpu7x:2x2x1
jax: 0.10.0
libtpu: 0.0.40
codegen_flags: <defaults>
</compile_context>

<pallas_src>
import jax
import jax.numpy as jnp
from jax.experimental import pallas as pl
from jax.experimental.pallas import tpu as pltpu


HIDDEN = 2000
HIDDEN_PAD = 2048  # 2000 zero-padded up to a multiple of 128 (lane-dense)


def mlp_kernel(x_ref,
               w1_ref, b1_ref,
               w2_ref, b2_ref,
               w3_ref, b3_ref,
               w4_ref, b4_ref,
               o_ref):
    # fc1 + tanh : bf16 x bf16 operands, f32 accumulation / activation.
    x = x_ref[...].astype(jnp.bfloat16)                              # (TB, 9)
    h1 = jnp.dot(x, w1_ref[...],
                 preferred_element_type=jnp.float32) + b1_ref[...]
    h1 = jnp.tanh(h1)                                                # (TB, 12) f32

    # fc2 + relu : bf16 activations x bf16 weights, f32 accumulation.
    h2 = jnp.dot(h1.astype(jnp.bfloat16), w2_ref[...],
                 preferred_element_type=jnp.float32) + b2_ref[...]
    h2 = jnp.maximum(h2, 0.0)                                        # (TB, 2048) f32

    # fc3 + relu : w3 stored natural (K, N) = (2048, 16) -> plain MXU matmul.
    h3 = jnp.dot(h2.astype(jnp.bfloat16), w3_ref[...],
                 preferred_element_type=jnp.float32) + b3_ref[...]
    h3 = jnp.maximum(h3, 0.0)                                        # (TB, 16) f32

    # fc4 (no activation).  Tiny matmul; left on the MXU (VPU/XLU fallback only
    # worth it if profiling shows the vmatmul-push slot saturating).
    o_ref[...] = jnp.dot(h3.astype(jnp.bfloat16), w4_ref[...],
                         preferred_element_type=jnp.float32) + b4_ref[...]


def mlp_forward(x, params, *, tile_b=512):
    (w1, b1), (w2, b2), (w3, b3), (w4, b4) = params
    B, in_dim = x.shape
    out_dim = b4.shape[1]

    # Batch tile: multiple of 8 sublanes, no larger than the (rounded) batch.
    B8 = ((B + 7) // 8) * 8
    tile_b = max(8, min(((tile_b + 7) // 8) * 8, B8))
    # v7x: keep >= 2 grid steps when the batch allows it so the "parallel"
    # batch axis can shard across both TensorCores (no cost on v5e/v6e).
    if B8 >= 16:
        tile_b = min(tile_b, ((B8 // 2 + 7) // 8) * 8)

    B_pad = pl.cdiv(B, tile_b) * tile_b
    if B_pad != B:
        x = jnp.pad(x, ((0, B_pad - B), (0, 0)))

    x_map = lambda i: (i, 0)
    w_map = lambda i: (0, 0)   # weights/biases: same block every step -> VMEM-resident

    out = pl.pallas_call(
        mlp_kernel,
        out_shape=jax.ShapeDtypeStruct((B_pad, out_dim), jnp.float32),
        grid_spec=pltpu.PrefetchScalarGridSpec(
            num_scalar_prefetch=0,
            grid=(B_pad // tile_b,),
            in_specs=[
                pl.BlockSpec((tile_b, in_dim), x_map),
                pl.BlockSpec(w1.shape, w_map),
                pl.BlockSpec(b1.shape, w_map),
                pl.BlockSpec(w2.shape, w_map),
                pl.BlockSpec(b2.shape, w_map),
                pl.BlockSpec(w3.shape, w_map),
                pl.BlockSpec(b3.shape, w_map),
                pl.BlockSpec(w4.shape, w_map),
                pl.BlockSpec(b4.shape, w_map),
            ],
            out_specs=pl.BlockSpec((tile_b, out_dim), x_map),
        ),
        compiler_params=pltpu.CompilerParams(
            dimension_semantics=("parallel",),
            # >= v5e's 16 MiB default; plenty for tile_b up to ~1024.
            vmem_limit_bytes=32 * 1024 * 1024,
        ),
    )(x, w1, b1, w2, b2, w3, b3, w4, b4)

    return out[:B]


def init_linear_params(key, in_features, out_features):
    """Deterministic init mimicking torch.nn.Linear's uniform(-1/sqrt(fan_in), ...).
    Stored as (in, out) == torch weight (out, in) transposed; bias as (1, out)."""
    kw, kb = jax.random.split(key)
    bound = 1.0 / (float(in_features) ** 0.5)
    w = jax.random.uniform(kw, (in_features, out_features), jnp.float32,
                           minval=-bound, maxval=bound)
    b = jax.random.uniform(kb, (1, out_features), jnp.float32,
                           minval=-bound, maxval=bound)
    return w, b


def prepare_params(raw_params):
    """Pad hidden 2000->2048, keep w3 in natural (K, N) layout, weights in bf16."""
    (w1, b1), (w2, b2), (w3, b3), (w4, b4) = raw_params
    pad = HIDDEN_PAD - HIDDEN
    w1b = w1.astype(jnp.bfloat16)                                  # (9, 12)
    w2p = jnp.pad(w2, ((0, 0), (0, pad))).astype(jnp.bfloat16)     # (12, 2048)
    b2p = jnp.pad(b2, ((0, 0), (0, pad)))                          # (1, 2048) f32
    w3p = jnp.pad(w3, ((0, pad), (0, 0))).astype(jnp.bfloat16)     # (2048, 16)
    w4b = w4.astype(jnp.bfloat16)                                  # (16, 1)
    return (w1b, b1), (w2p, b2p), (w3p, b3), (w4b, b4)


def reference_forward_raw(x, raw_params):
    """Exact f32 reference with the original (unpadded, f32) parameters."""
    (w1, b1), (w2, b2), (w3, b3), (w4, b4) = raw_params
    hi = jax.lax.Precision.HIGHEST
    h = jnp.tanh(jnp.dot(x, w1, precision=hi) + b1)
    h = jnp.maximum(jnp.dot(h, w2, precision=hi) + b2, 0.0)
    h = jnp.maximum(jnp.dot(h, w3, precision=hi) + b3, 0.0)
    return jnp.dot(h, w4, precision=hi) + b4


def reference_forward_prepared(x, params):
    """Pure-JAX forward replicating the kernel's bf16 operand rounding exactly
    (bf16 x bf16 products are exact in f32, so only accumulation order differs)."""
    (w1, b1), (w2, b2), (w3, b3), (w4, b4) = params
    hi = jax.lax.Precision.HIGHEST
    bf = lambda a: a.astype(jnp.bfloat16).astype(jnp.float32)
    h = jnp.tanh(jnp.dot(bf(x), bf(w1), precision=hi) + b1)
    h = jnp.maximum(jnp.dot(bf(h), bf(w2), precision=hi) + b2, 0.0)
    h = jnp.maximum(jnp.dot(bf(h), bf(w3), precision=hi) + b3, 0.0)
    return jnp.dot(bf(h), bf(w4), precision=hi) + b4


if __name__ == "__main__":
    input_size = 9
    output_size = 1
    batch = 8

    key = jax.random.PRNGKey(0)
    k_x, k1, k2, k3, k4 = jax.random.split(key, 5)

    raw_params = (
        init_linear_params(k1, input_size, 12),
        init_linear_params(k2, 12, HIDDEN),
        init_linear_params(k3, HIDDEN, 16),
        init_linear_params(k4, 16, output_size),
    )
    params = prepare_params(raw_params)

    x = jax.random.normal(k_x, (batch, input_size), jnp.float32)

    out = jax.block_until_ready(mlp_forward(x, params))
    assert out.shape == (batch, output_size), out.shape

    # Tight check: reference with matching bf16 operand rounding (only f32
    # accumulation order differs from the kernel).
    ref_tight = reference_forward_prepared(x, params)
    assert jnp.allclose(out, ref_tight, atol=1e-3, rtol=1e-3), \
        "mismatch vs bf16-matched reference"

    # Loose check: original f32 model (difference = bf16 weight/activation rounding).
    ref_orig = reference_forward_raw(x, raw_params)
    assert jnp.allclose(out, ref_orig, atol=5e-2, rtol=5e-2), \
        "mismatch vs original f32 reference"

    print("KERNEL_OK")
</pallas_src>

<mosaic_0001>
module attributes {stable_mosaic.version = 11 : i64} {
  func.func @mlp_kernel(%arg0: i32, %arg1: memref<8x9xf32, #tpu.memory_space<vmem>>, %arg2: memref<9x12xbf16, #tpu.memory_space<vmem>>, %arg3: memref<1x12xf32, #tpu.memory_space<vmem>>, %arg4: memref<12x2048xbf16, #tpu.memory_space<vmem>>, %arg5: memref<1x2048xf32, #tpu.memory_space<vmem>>, %arg6: memref<2048x16xbf16, #tpu.memory_space<vmem>>, %arg7: memref<1x16xf32, #tpu.memory_space<vmem>>, %arg8: memref<16x1xbf16, #tpu.memory_space<vmem>>, %arg9: memref<1x1xf32, #tpu.memory_space<vmem>>, %arg10: memref<8x1xf32, #tpu.memory_space<vmem>>) attributes {dimension_semantics = [#tpu.dimension_semantics<parallel>], iteration_bounds = array<i64: 1>, scalar_prefetch = 0 : i64, scratch_operands = 0 : i64, tpu.core_type = #tpu.core_type<tc>, window_params = [{transform_indices = @transform_0, window_bounds = array<i64: 8, 9>}, {pipeline_mode = #tpu.pipeline_mode<synchronous>, transform_indices = @transform_1, window_bounds = array<i64: 9, 12>}, {pipeline_mode = #tpu.pipeline_mode<synchronous>, transform_indices = @transform_2, window_bounds = array<i64: 1, 12>}, {pipeline_mode = #tpu.pipeline_mode<synchronous>, transform_indices = @transform_3, window_bounds = array<i64: 12, 2048>}, {pipeline_mode = #tpu.pipeline_mode<synchronous>, transform_indices = @transform_4, window_bounds = array<i64: 1, 2048>}, {pipeline_mode = #tpu.pipeline_mode<synchronous>, transform_indices = @transform_5, window_bounds = array<i64: 2048, 16>}, {pipeline_mode = #tpu.pipeline_mode<synchronous>, transform_indices = @transform_6, window_bounds = array<i64: 1, 16>}, {pipeline_mode = #tpu.pipeline_mode<synchronous>, transform_indices = @transform_7, window_bounds = array<i64: 16, 1>}, {pipeline_mode = #tpu.pipeline_mode<synchronous>, transform_indices = @transform_8, window_bounds = array<i64: 1, 1>}, {transform_indices = @transform_9, window_bounds = array<i64: 8, 1>}]} {
    %c0 = arith.constant 0 : index
    %c0_0 = arith.constant 0 : index
    %0 = vector.load %arg1[%c0, %c0_0] : memref<8x9xf32, #tpu.memory_space<vmem>>, vector<8x9xf32>
    %1 = arith.truncf %0 : vector<8x9xf32> to vector<8x9xbf16>
    %c0_1 = arith.constant 0 : index
    %c0_2 = arith.constant 0 : index
    %2 = vector.load %arg2[%c0_1, %c0_2] : memref<9x12xbf16, #tpu.memory_space<vmem>>, vector<9x12xbf16>
    %cst = arith.constant dense<0.000000e+00> : vector<8x12xf32>
    %3 = tpu.matmul %1, %2, %cst {dimension_numbers = #tpu.dot_dimension_numbers<[1], [0], [0], [1], [0, 0, 1, 1], [], []>} : vector<8x9xbf16>, vector<9x12xbf16>, vector<8x12xf32> -> vector<8x12xf32>
    %c0_3 = arith.constant 0 : index
    %c0_4 = arith.constant 0 : index
    %4 = vector.load %arg3[%c0_3, %c0_4] : memref<1x12xf32, #tpu.memory_space<vmem>>, vector<1x12xf32>
    %5 = vector.broadcast %4 : vector<1x12xf32> to vector<8x12xf32>
    %6 = arith.addf %3, %5 : vector<8x12xf32>
    %7 = math.tanh %6 : vector<8x12xf32>
    %8 = arith.truncf %7 : vector<8x12xf32> to vector<8x12xbf16>
    %c0_5 = arith.constant 0 : index
    %c0_6 = arith.constant 0 : index
    %9 = vector.load %arg4[%c0_5, %c0_6] : memref<12x2048xbf16, #tpu.memory_space<vmem>>, vector<12x2048xbf16>
    %cst_7 = arith.constant dense<0.000000e+00> : vector<8x2048xf32>
    %10 = tpu.matmul %8, %9, %cst_7 {dimension_numbers = #tpu.dot_dimension_numbers<[1], [0], [0], [1], [0, 0, 1, 1], [], []>} : vector<8x12xbf16>, vector<12x2048xbf16>, vector<8x2048xf32> -> vector<8x2048xf32>
    %c0_8 = arith.constant 0 : index
    %c0_9 = arith.constant 0 : index
    %11 = vector.load %arg5[%c0_8, %c0_9] : memref<1x2048xf32, #tpu.memory_space<vmem>>, vector<1x2048xf32>
    %12 = vector.broadcast %11 : vector<1x2048xf32> to vector<8x2048xf32>
    %13 = arith.addf %10, %12 : vector<8x2048xf32>
    %cst_10 = arith.constant 0.000000e+00 : f32
    %14 = vector.broadcast %cst_10 : f32 to vector<8x2048xf32>
    %15 = arith.maximumf %13, %14 : vector<8x2048xf32>
    %16 = arith.truncf %15 : vector<8x2048xf32> to vector<8x2048xbf16>
    %c0_11 = arith.constant 0 : index
    %c0_12 = arith.constant 0 : index
    %17 = vector.load %arg6[%c0_11, %c0_12] : memref<2048x16xbf16, #tpu.memory_space<vmem>>, vector<2048x16xbf16>
    %cst_13 = arith.constant dense<0.000000e+00> : vector<8x16xf32>
    %18 = tpu.matmul %16, %17, %cst_13 {dimension_numbers = #tpu.dot_dimension_numbers<[1], [0], [0], [1], [0, 0, 1, 1], [], []>} : vector<8x2048xbf16>, vector<2048x16xbf16>, vector<8x16xf32> -> vector<8x16xf32>
    %c0_14 = arith.constant 0 : index
    %c0_15 = arith.constant 0 : index
    %19 = vector.load %arg7[%c0_14, %c0_15] : memref<1x16xf32, #tpu.memory_space<vmem>>, vector<1x16xf32>
    %20 = vector.broadcast %19 : vector<1x16xf32> to vector<8x16xf32>
    %21 = arith.addf %18, %20 : vector<8x16xf32>
    %cst_16 = arith.constant 0.000000e+00 : f32
    %22 = vector.broadcast %cst_16 : f32 to vector<8x16xf32>
    %23 = arith.maximumf %21, %22 : vector<8x16xf32>
    %24 = arith.truncf %23 : vector<8x16xf32> to vector<8x16xbf16>
    %c0_17 = arith.constant 0 : index
    %c0_18 = arith.constant 0 : index
    %25 = vector.load %arg8[%c0_17, %c0_18] : memref<16x1xbf16, #tpu.memory_space<vmem>>, vector<16x1xbf16>
    %cst_19 = arith.constant dense<0.000000e+00> : vector<8x1xf32>
    %26 = tpu.matmul %24, %25, %cst_19 {dimension_numbers = #tpu.dot_dimension_numbers<[1], [0], [0], [1], [0, 0, 1, 1], [], []>} : vector<8x16xbf16>, vector<16x1xbf16>, vector<8x1xf32> -> vector<8x1xf32>
    %c0_20 = arith.constant 0 : index
    %c0_21 = arith.constant 0 : index
    %27 = vector.load %arg9[%c0_20, %c0_21] : memref<1x1xf32, #tpu.memory_space<vmem>>, vector<1x1xf32>
    %28 = vector.broadcast %27 : vector<1x1xf32> to vector<8x1xf32>
    %29 = arith.addf %26, %28 : vector<8x1xf32>
    %c0_22 = arith.constant 0 : index
    %c0_23 = arith.constant 0 : index
    %30 = vector.load %arg10[%c0_22, %c0_23] : memref<8x1xf32, #tpu.memory_space<vmem>>, vector<8x1xf32>
    tpu.vector_store %arg10[%c0_22, %c0_23], %29 {strides = array<i32>} : memref<8x1xf32, #tpu.memory_space<vmem>>, vector<8x1xf32>,
    return
  }
  func.func @transform_0(%arg0: i32) -> (i32, i32) {
    %c0_i32 = arith.constant 0 : i32
    %c0_i32_0 = arith.constant 0 : i32
    return %arg0, %c0_i32 : i32, i32
  }
  func.func @transform_1(%arg0: i32) -> (i32, i32) {
    %c0_i32 = arith.constant 0 : i32
    %c0_i32_0 = arith.constant 0 : i32
    %c0_i32_1 = arith.constant 0 : i32
    return %c0_i32, %c0_i32_0 : i32, i32
  }
  func.func @transform_2(%arg0: i32) -> (i32, i32) {
    %c0_i32 = arith.constant 0 : i32
    %c0_i32_0 = arith.constant 0 : i32
    %c0_i32_1 = arith.constant 0 : i32
    return %c0_i32, %c0_i32_0 : i32, i32
  }
  func.func @transform_3(%arg0: i32) -> (i32, i32) {
    %c0_i32 = arith.constant 0 : i32
    %c0_i32_0 = arith.constant 0 : i32
    %c0_i32_1 = arith.constant 0 : i32
    return %c0_i32, %c0_i32_0 : i32, i32
  }
  func.func @transform_4(%arg0: i32) -> (i32, i32) {
    %c0_i32 = arith.constant 0 : i32
    %c0_i32_0 = arith.constant 0 : i32
    %c0_i32_1 = arith.constant 0 : i32
    return %c0_i32, %c0_i32_0 : i32, i32
  }
  func.func @transform_5(%arg0: i32) -> (i32, i32) {
    %c0_i32 = arith.constant 0 : i32
    %c0_i32_0 = arith.constant 0 : i32
    %c0_i32_1 = arith.constant 0 : i32
    return %c0_i32, %c0_i32_0 : i32, i32
  }
  func.func @transform_6(%arg0: i32) -> (i32, i32) {
    %c0_i32 = arith.constant 0 : i32
    %c0_i32_0 = arith.constant 0 : i32
    %c0_i32_1 = arith.constant 0 : i32
    return %c0_i32, %c0_i32_0 : i32, i32
  }
  func.func @transform_7(%arg0: i32) -> (i32, i32) {
    %c0_i32 = arith.constant 0 : i32
    %c0_i32_0 = arith.constant 0 : i32
    %c0_i32_1 = arith.constant 0 : i32
    return %c0_i32, %c0_i32_0 : i32, i32
  }
  func.func @transform_8(%arg0: i32) -> (i32, i32) {
    %c0_i32 = arith.constant 0 : i32
    %c0_i32_0 = arith.constant 0 : i32
    %c0_i32_1 = arith.constant 0 : i32
    return %c0_i32, %c0_i32_0 : i32, i32
  }
  func.func @transform_9(%arg0: i32) -> (i32, i32) {
    %c0_i32 = arith.constant 0 : i32
    %c0_i32_0 = arith.constant 0 : i32
    return %arg0, %c0_i32 : i32, i32
  }
}

</mosaic_0001>

<bundles_post_ra>
// kernel: tpu_custom_call.1
= control target key start
LH: loop header
LB: loop body
LE: loop exit
PB: predicated region body
PF: predicated region fallthrough
CT: control target
= control target key end

     0   :  { %vm55_vm0 = vcmask 1043456   ;;  %vm56_vm1 = vcmask 1044480   ;;  %v2594_v0 = vmov 0.0   ;;  %v2595_v2 = vmov 65535   ;;  %s3222_s1 = inlined_call_operand.vmem [shape: bf16[9,12], index: 1, kind: input, shape index: {}]   ;;  %s3223_s0 = inlined_call_operand.vmem [shape: f32[8,9], index: 0, kind: input, shape index: {}]   ;;  %s3224_s3 = inlined_call_operand.vmem [shape: bf16[12,2048], index: 3, kind: input, shape index: {}]   ;;  %s3225_s5 = inlined_call_operand.vmem [shape: bf16[2048,16], index: 5, kind: input, shape index: {}]   ;;  %s3226_s2 = inlined_call_operand.vmem [shape: f32[1,12], index: 2, kind: input, shape index: {}]   ;;  %s3227_s4 = inlined_call_operand.vmem [shape: f32[1,2048], index: 4, kind: input, shape index: {}]   ;;  %s3228_s7 = inlined_call_operand.vmem [shape: bf16[16,1], index: 7, kind: input, shape index: {}]   ;;  %s3229_s8 = inlined_call_operand.<no memory space> [shape: f32[1,1], index: 8, kind: input, shape index: {}]   ;;  %s3230_s6 = inlined_call_operand.vmem [shape: f32[1,16], index: 6, kind: input, shape index: {}]   ;;  %s3231_s9 = inlined_call_operand.vmem [shape: f32[8,1], index: 9, kind: output, shape index: {}]  }
   0x1   :  { %2446 = vmatprep.subr.bf16.mxu0 %v2594_v0  ;;  %v2462_v1 = vld [vmem:[%s3222_s1] sm:$0x1f]   ;;  %v57_v3 = vsel %vm55_vm0, 4294967295, %v2595_v2  ;;  %vm2596_vm2 = vmmov 0   ;;  %vm51_vm3 = vcmask 72704   ;;  %v105_v8 = vld [vmem:[%s3224_s3 + $0x8] sm:$0xff] }
   0x2   :  { %v35_v4 = vld [vmem:[%s3223_s0] sm:$0xff]  ;;  %v58_v5 = vsel %vm56_vm1, %v57_v3, 0  ;;  %2448 = vmatprep.mubr.msk.bf16.mxu0 %vm2596_vm2, %v2594_v0  ;;  %v113_v9 = vld [vmem:[%s3224_s3 + $0x48] sm:$0x33]  ;;  %vm272_vm4 = vcmask 1045504   ;;  %v2597_v18 = vmov 0  }
   0x3   :  { %v60_v6 = vand.u32 %v2462_v1, %v58_v5  ;;  %v36_v7 = vpack.c.bf16 %v35_v4, %v35_v4  ;;  %v104_v10 = vld [vmem:[%s3224_s3] sm:$0xff]  ;;  %v2105_v11 = vcombine.high %v105_v8, %v113_v9  ;;  %v2104_v12 = vcombine.low %v105_v8, %v113_v9  ;;  %353 = vmatprep.mubr.bf16.mxu1 %v2597_v18  ;;  %v106_v19 = vld [vmem:[%s3224_s3 + $0x10] sm:$0xff]  ;;  %v107_v21 = vld [vmem:[%s3224_s3 + $0x18] sm:$0xff] }
   0x4   :  { %v112_v13 = vld [vmem:[%s3224_s3 + $0x40] sm:$0x33]  ;;  %v114_v20 = vld [vmem:[%s3224_s3 + $0x50] sm:$0x33]  ;;  %v115_v23 = vld [vmem:[%s3224_s3 + $0x58] sm:$0x33] }
   0x5   :  { %2447 = vmatpush3.bf16.msra.mxu0 %v60_v6  ;;  %v2103_v14 = vcombine.high %v104_v10, %v112_v13  ;;  %v2102_v15 = vcombine.low %v104_v10, %v112_v13  ;;  %v280_v16 = vsel %vm272_vm4, %v2104_v12, 0  ;;  %v2107_v22 = vcombine.high %v106_v19, %v114_v20  ;;  %v2099_v27 = vld [vmem:[%s3226_s2] ss:$0 sm:$0xff]  ;;  %v109_v35 = vld [vmem:[%s3224_s3 + $0x28] sm:$0xff]  ;;  %v110_v45 = vld [vmem:[%s3224_s3 + $0x30] sm:$0xff] }
   0x6   :  { %2120 = vmatprep.subr.msk.bf16.mxu0 %vm272_vm4, %v2105_v11  ;;  %v2106_v24 = vcombine.low %v106_v19, %v114_v20  ;;  %v2109_v25 = vcombine.high %v107_v21, %v115_v23  ;;  %v2108_v26 = vcombine.low %v107_v21, %v115_v23  ;;  %v108_v33 = vld [vmem:[%s3224_s3 + $0x20] sm:$0xff]  ;;  %v117_v36 = vld [vmem:[%s3224_s3 + $0x68] sm:$0x33]  ;;  %vm268_vm5 = vcmask 97280   ;;  %v118_v46 = vld [vmem:[%s3224_s3 + $0x70] sm:$0x33] }
   0x7   :  { %2118 = vmatprep.subr.msk.bf16.mxu1 %vm272_vm4, %v2103_v14  ;;  %v274_v17 = vsel %vm272_vm4, %v2102_v15, 0  ;;  %v116_v34 = vld [vmem:[%s3224_s3 + $0x60] sm:$0x33]  ;;  %v2113_v42 = vcombine.high %v109_v35, %v117_v36  ;;  %v2112_v44 = vcombine.low %v109_v35, %v117_v36  ;;  %v111_v47 = vld [vmem:[%s3224_s3 + $0x38] sm:$0xff]  ;;  %v2115_v51 = vcombine.high %v110_v45, %v118_v46  ;;  %v2467_v61 = vld [vmem:[%s3225_s5 + $0x48] sm:$0xff]  }
   0x8   :  { %2449 = vmatmul.mubr.msk.bf16.vlgmr.msra.gmra.mrb[0].mxu0 %vm51_vm3, %v36_v7  ;;  %322 = vmatpush1.bf16.msra.mxu1 %v274_v17  ;;  %v286_v39 = vsel %vm272_vm4, %v2106_v24, 0  ;;  %v292_v40 = vsel %vm272_vm4, %v2108_v26, 0  ;;  %v2111_v41 = vcombine.high %v108_v33, %v116_v34  ;;  %v2110_v43 = vcombine.low %v108_v33, %v116_v34  ;;  %v119_v48 = vld [vmem:[%s3224_s3 + $0x78] sm:$0x33]  ;;  %v2463_v57 = vld [vmem:[%s3225_s5 + $0x40] sm:$0xff]   ;;  %v2468_v62 = vld [vmem:[%s3225_s5 + $0xc8] sm:$0xff]  }
   0x9   :  { %363 = vmatpush1.bf16.msra.mxu0 %v280_v16  ;;  %394 = vmatprep.mubr.bf16.mxu0 %v2597_v18  ;;  %v304_v50 = vsel %vm272_vm4, %v2112_v44, 0  ;;  %v2117_v52 = vcombine.high %v111_v47, %v119_v48  ;;  %v2114_v53 = vcombine.low %v110_v45, %v118_v46  ;;  %v2116_v54 = vcombine.low %v111_v47, %v119_v48  ;;  %v2464_v58 = vld [vmem:[%s3225_s5 + $0xc0] sm:$0xff]   ;;  %v2469_v63 = vld [vmem:[%s3225_s5 + $0x8] sm:$0xff]   ;;  %v2471_v2 = vld [vmem:[%s3225_s5 + $0x50] sm:$0xff]  }
   0xa   :  { %2122 = vmatprep.subr.msk.bf16.mxu1 %vm272_vm4, %v2107_v22  ;;  %2124 = vmatprep.subr.msk.bf16.mxu0 %vm272_vm4, %v2109_v25  ;;  %v298_v49 = vsel %vm272_vm4, %v2110_v43, 0  ;;  %v2465_v59 = vld [vmem:[%s3225_s5] sm:$0xff]   ;;  %v2470_v1 = vld [vmem:[%s3225_s5 + $0x88] sm:$0xff]   ;;  %v2472_v3 = vld [vmem:[%s3225_s5 + $0xd0] sm:$0xff]   ;;  %vm2049_vm6 = vcmask 130048   ;;  %vm2093_vm7 = vcmask 7168  }
   0xb   :  { %v310_v55 = vsel %vm272_vm4, %v2114_v53, 0  ;;  %v316_v56 = vsel %vm272_vm4, %v2116_v54, 0  ;;  %v2466_v60 = vld [vmem:[%s3225_s5 + $0x80] sm:$0xff]   ;;  %v2473_v4 = vld [vmem:[%s3225_s5 + $0x10] sm:$0xff]   ;;  %v2475_v6 = vld [vmem:[%s3225_s5 + $0x58] sm:$0xff]  }
   0xc   :  { %v2474_v5 = vld [vmem:[%s3225_s5 + $0x90] sm:$0xff]   ;;  %v2476_v7 = vld [vmem:[%s3225_s5 + $0xd8] sm:$0xff]   ;;  %v2479_v10 = vld [vmem:[%s3225_s5 + $0x60] sm:$0xff]  }
   0xd   :  { %v2477_v8 = vld [vmem:[%s3225_s5 + $0x18] sm:$0xff]   ;;  %v2480_v11 = vld [vmem:[%s3225_s5 + $0xe0] sm:$0xff]   ;;  %v2483_v14 = vld [vmem:[%s3225_s5 + $0x68] sm:$0xff]  }
   0xe   :  { %v2478_v9 = vld [vmem:[%s3225_s5 + $0x98] sm:$0xff]   ;;  %v2481_v12 = vld [vmem:[%s3225_s5 + $0x20] sm:$0xff]   ;;  %v2484_v15 = vld [vmem:[%s3225_s5 + $0xe8] sm:$0xff]  }
   0xf   :  { %v2482_v13 = vld [vmem:[%s3225_s5 + $0xa0] sm:$0xff]   ;;  %v2485_v16 = vld [vmem:[%s3225_s5 + $0x28] sm:$0xff]   ;;  %v2488_v19 = vld [vmem:[%s3225_s5 + $0xf0] sm:$0xff]  }
  0x10   :  { %v2486_v17 = vld [vmem:[%s3225_s5 + $0xa8] sm:$0xff]   ;;  %v2489_v20 = vld [vmem:[%s3225_s5 + $0x30] sm:$0xff]   ;;  %v2491_v22 = vld [vmem:[%s3225_s5 + $0x78] sm:$0xff]  }
  0x11   :  { %v2490_v21 = vld [vmem:[%s3225_s5 + $0xb0] sm:$0xff]   ;;  %v2492_v23 = vld [vmem:[%s3225_s5 + $0xf8] sm:$0xff]   ;;  %v2495_v26 = vld [vmem:[%s3225_s5 + $0x140] sm:$0xff]  }
  0x12   :  { %v2493_v24 = vld [vmem:[%s3225_s5 + $0x38] sm:$0xff]   ;;  %v2860_v35 = vld [vmem:[%s3227_s4] sm:$0xff] }
  0x13   :  { %v2494_v25 = vld [vmem:[%s3225_s5 + $0xb8] sm:$0xff]  }
  0xdb   :  { %v96_v28 = vpop.f32.mrb[0].mxu0 }
  0xdc   :  { %v97_v29 = vadd.f32 %v2099_v27, %v96_v28  ;;  %v2450_v30 = vpop.f32.mrb[1].mxu0  ;;  %v2496_v27 = vld [vmem:[%s3225_s5 + $0x1c0] sm:$0xff]   ;;  %v124_v28 = vlaneseq }
  0xdd   :  { %v99_v31 = vpop.f32.mrb[2].mxu0 }
  0xde   :  { %2592 = vtanh.f32 %v97_v29  ;;  %v2451_v32 = vpop.f32.mrb[3].mxu0  ;;  %v2842_v29 = vshrl.u32 %v124_v28, 7  ;;  %v2848_v31 = vld [vmem:[%s3227_s4 + $0x8] sm:$0xff]  ;;  %v2506_v28 = vld [vmem:[%s3225_s5 + $0x190] sm:$0xff]  }
  0xe0   :  { %v150_v30 = vsub.s32 6, %v2842_v29  ;;  %v126_v33 = vsub.s32 0, %v2842_v29  ;;  %v134_v34 = vsub.s32 2, %v2842_v29  ;;  %v130_v36 = vsub.s32 1, %v2842_v29 }
  0xe1   :  { %v154_v53 = vsub.s32 7, %v2842_v29 }
  0xe2   :  { %v2853_v32 = vrot.slane %v2848_v31, %v150_v30 }
  0xe8   :  { %v2593_v37 = vpop.eup %2592 }
  0xe9   :  { %v103_v38 = vpack.c.bf16 %v2593_v37, %v2593_v37  ;;  %v138_v37 = vsub.s32 3, %v2842_v29 }
  0xeb   :  { %2119 = vmatmul.mubr.msk.bf16.vlgmr.msra.gmra.mrb[0].mxu1 %vm268_vm5, %v103_v38  ;;  %2121 = vmatmul.mubr.msk.bf16.vlgmr.msra.gmra.mrb[4].mxu0 %vm268_vm5, %v103_v38 }
  0xec   :  { %404 = vmatpush1.bf16.msra.mxu1 %v286_v39  ;;  %445 = vmatpush1.bf16.msra.mxu0 %v292_v40  ;;  %v135_v39 = vrot.slane %v2860_v35, %v134_v34  ;;  %v131_v40 = vrot.slane %v2860_v35, %v130_v36 }
  0xed   :  { %435 = vmatprep.mubr.bf16.mxu1 %v2597_v18  ;;  %476 = vmatprep.mubr.bf16.mxu0 %v2597_v18 }
  0xee   :  { %2126 = vmatprep.subr.msk.bf16.mxu1 %vm272_vm4, %v2111_v41  ;;  %2128 = vmatprep.subr.msk.bf16.mxu0 %vm272_vm4, %v2113_v42  ;;  %v139_v41 = vrot.slane %v2860_v35, %v138_v37 }
  0xf3   :  { %2123 = vmatmul.mubr.msk.bf16.vlgmr.msra.gmra.mrb[4].mxu1 %vm268_vm5, %v103_v38  ;;  %2125 = vmatmul.mubr.msk.bf16.vlgmr.msra.gmra.mrb[8].mxu0 %vm268_vm5, %v103_v38 }
  0xf4   :  { %486 = vmatpush1.bf16.msra.mxu1 %v298_v49  ;;  %527 = vmatpush1.bf16.msra.mxu0 %v304_v50 }
  0xf5   :  { %517 = vmatprep.mubr.bf16.mxu1 %v2597_v18  ;;  %558 = vmatprep.mubr.bf16.mxu0 %v2597_v18 }
  0xf6   :  { %2130 = vmatprep.subr.msk.bf16.mxu1 %vm272_vm4, %v2115_v51  ;;  %2132 = vmatprep.subr.msk.bf16.mxu0 %vm272_vm4, %v2117_v52  ;;  %v146_v52 = vsub.s32 5, %v2842_v29 }
  0xfb   :  { %2127 = vmatmul.mubr.msk.bf16.vlgmr.msra.gmra.mrb[8].mxu1 %vm268_vm5, %v103_v38  ;;  %2129 = vmatmul.mubr.msk.bf16.vlgmr.msra.gmra.mrb[12].mxu0 %vm268_vm5, %v103_v38 }
  0xfc   :  { %568 = vmatpush1.bf16.msra.mxu1 %v310_v55  ;;  %609 = vmatpush1.bf16.msra.mxu0 %v316_v56 }
  0xfd   :  { %599 = vmatprep.mubr.bf16.mxu1 %v2597_v18  ;;  %640 = vmatprep.mubr.bf16.mxu0 %v2597_v18  ;;  %v2487_v18 = vld [vmem:[%s3225_s5 + $0x70] sm:$0xff]  }
  0xfe   :  { %2268 = vmatprep.subr.bf16.mxu1 %v2463_v57  ;;  %2290 = vmatprep.subr.bf16.mxu0 %v2464_v58 }
 0x103   :  { %2131 = vmatmul.mubr.msk.bf16.vlgmr.msra.gmra.mrb[12].mxu1 %vm268_vm5, %v103_v38  ;;  %2133 = vmatmul.mubr.msk.bf16.vlgmr.msra.gmra.mrb[16].mxu0 %vm268_vm5, %v103_v38  ;;  %v127_v38 = vrot.slane %v2860_v35, %v126_v33 }
 0x104   :  { %2269 = vmatpush3.bf16.msra.mxu1 %v2465_v59  ;;  %2291 = vmatpush3.bf16.msra.mxu0 %v2466_v60 }
 0x105   :  { %2270 = vmatprep.subr.bf16.mxu1 %v2467_v61  ;;  %2292 = vmatprep.subr.bf16.mxu0 %v2468_v62  ;;  %v147_v62 = vrot.slane %v2860_v35, %v146_v52 }
 0x108   :  { %2271 = vmatpush3.bf16.msra.mxu1 %v2469_v63  ;;  %2293 = vmatpush3.bf16.msra.mxu0 %v2470_v1  ;;  %v155_v63 = vrot.slane %v2860_v35, %v154_v53  ;;  %v2497_v1 = vld [vmem:[%s3225_s5 + $0x100] sm:$0xff]  }
 0x109   :  { %2272 = vmatprep.subr.bf16.mxu1 %v2471_v2  ;;  %2294 = vmatprep.subr.bf16.mxu0 %v2472_v3  ;;  %v2498_v2 = vld [vmem:[%s3225_s5 + $0x180] sm:$0xff]  }
 0x10c   :  { %2273 = vmatpush3.bf16.msra.mxu1 %v2473_v4  ;;  %2295 = vmatpush3.bf16.msra.mxu0 %v2474_v5  ;;  %v2499_v5 = vld [vmem:[%s3225_s5 + $0x148] sm:$0xff]  }
 0x10d   :  { %2274 = vmatprep.subr.bf16.mxu1 %v2475_v6  ;;  %2296 = vmatprep.subr.bf16.mxu0 %v2476_v7  ;;  %v2500_v6 = vld [vmem:[%s3225_s5 + $0x1c8] sm:$0xff]  }
 0x110   :  { %2275 = vmatpush3.bf16.msra.mxu1 %v2477_v8  ;;  %2297 = vmatpush3.bf16.msra.mxu0 %v2478_v9 }
 0x111   :  { %2276 = vmatprep.subr.bf16.mxu1 %v2479_v10  ;;  %2298 = vmatprep.subr.bf16.mxu0 %v2480_v11 }
 0x114   :  { %2277 = vmatpush3.bf16.msra.mxu1 %v2481_v12  ;;  %2299 = vmatpush3.bf16.msra.mxu0 %v2482_v13 }
 0x115   :  { %2278 = vmatprep.subr.bf16.mxu1 %v2483_v14  ;;  %2300 = vmatprep.subr.bf16.mxu0 %v2484_v15  ;;  %v2501_v15 = vld [vmem:[%s3225_s5 + $0x108] sm:$0xff]  }
 0x118   :  { %2279 = vmatpush3.bf16.msra.mxu1 %v2485_v16  ;;  %2301 = vmatpush3.bf16.msra.mxu0 %v2486_v17  ;;  %v2502_v16 = vld [vmem:[%s3225_s5 + $0x188] sm:$0xff]  }
 0x119   :  { %2280 = vmatprep.subr.bf16.mxu1 %v2487_v18  ;;  %2302 = vmatprep.subr.bf16.mxu0 %v2488_v19  ;;  %v2503_v19 = vld [vmem:[%s3225_s5 + $0x150] sm:$0xff]  }
 0x11c   :  { %2281 = vmatpush3.bf16.msra.mxu1 %v2489_v20  ;;  %2303 = vmatpush3.bf16.msra.mxu0 %v2490_v21  ;;  %v2504_v20 = vld [vmem:[%s3225_s5 + $0x1d0] sm:$0xff]  }
 0x11d   :  { %2282 = vmatprep.subr.bf16.mxu1 %v2491_v22  ;;  %2304 = vmatprep.subr.bf16.mxu0 %v2492_v23  ;;  %v159_v23 = vrot.slane %v2848_v31, %v126_v33  ;;  %v2507_v33 = vld [vmem:[%s3225_s5 + $0x158] sm:$0xff]  }
 0x120   :  { %2283 = vmatpush3.bf16.msra.mxu1 %v2493_v24  ;;  %2305 = vmatpush3.bf16.msra.mxu0 %v2494_v25  ;;  %v167_v24 = vrot.slane %v2848_v31, %v134_v34  ;;  %v2508_v34 = vld [vmem:[%s3225_s5 + $0x1d8] sm:$0xff]  }
 0x121   :  { %2312 = vmatprep.subr.bf16.mxu1 %v2495_v26  ;;  %2334 = vmatprep.subr.bf16.mxu0 %v2496_v27  ;;  %v2505_v27 = vld [vmem:[%s3225_s5 + $0x110] sm:$0xff]  }
 0x1be   :  { %v355_v42 = vpop.f32.mrb[0].mxu1  ;;  %v396_v43 = vpop.f32.mrb[4].mxu0 }
 0x1bf   :  { %v356_v44 = vadd.f32 %v355_v42, %v127_v38  ;;  %v397_v45 = vadd.f32 %v396_v43, %v135_v39  ;;  %v357_v46 = vpop.f32.mrb[1].mxu1  ;;  %v398_v47 = vpop.f32.mrb[5].mxu0 }
 0x1c0   :  { %v358_v48 = vadd.f32 %v357_v46, %v131_v40  ;;  %v399_v49 = vadd.f32 %v398_v47, %v139_v41  ;;  %v359_v50 = vpop.f32.mrb[2].mxu1  ;;  %v400_v51 = vpop.f32.mrb[6].mxu0  ;;  %v2509_v46 = vld [vmem:[%s3225_s5 + $0x118] sm:$0xff]  }
 0x1c1   :  { %v649_v54 = vmax.f32 %v356_v44, 0.0  ;;  %v651_v55 = vmax.f32 %v397_v45, 0.0  ;;  %v360_v56 = vpop.f32.mrb[3].mxu1  ;;  %v401_v57 = vpop.f32.mrb[7].mxu0  ;;  %v2510_v47 = vld [vmem:[%s3225_s5 + $0x198] sm:$0xff]   ;;  %v2511_v51 = vld [vmem:[%s3225_s5 + $0x160] sm:$0xff]  }
 0x1c2   :  { %v650_v58 = vmax.f32 %v358_v48, 0.0  ;;  %v652_v59 = vmax.f32 %v399_v49, 0.0  ;;  %v142_v48 = vsub.s32 4, %v2842_v29  ;;  %v2513_v56 = vld [vmem:[%s3225_s5 + $0x120] sm:$0xff]   ;;  %v2556_v29 = vld [vmem:[%s3225_s5 + $0x2f8] sm:$0xff]  }
 0x1c3   :  { %v665_v3 = vpack.c.bf16 %v649_v54, %v649_v54  ;;  %v667_v4 = vpack.c.bf16 %v651_v55, %v651_v55  ;;  %v2512_v54 = vld [vmem:[%s3225_s5 + $0x1e0] sm:$0xff]  }
 0x1c4   :  { %v666_v60 = vpack.c.bf16 %v650_v58, %v650_v58  ;;  %v668_v61 = vpack.c.bf16 %v652_v59, %v652_v59  ;;  %v175_v55 = vrot.slane %v2848_v31, %v142_v48  ;;  %v2514_v57 = vld [vmem:[%s3225_s5 + $0x1a0] sm:$0xff]   ;;  %v2515_v58 = vld [vmem:[%s3225_s5 + $0x168] sm:$0xff]  }
 0x1c5   :  { %v2516_v59 = vld [vmem:[%s3225_s5 + $0x1e8] sm:$0xff]  }
 0x1c6   :  { %v2892_v7 = vpop.f32.mrb[4].mxu1  ;;  %v2894_v8 = vpop.f32.mrb[8].mxu0  ;;  %1744 = vmatprep.mubr.bf16.mxu1 %v666_v60  ;;  %1784 = vmatprep.mubr.bf16.mxu0 %v668_v61 }
 0x1c7   :  { %v439_v9 = vpop.f32.mrb[5].mxu1  ;;  %v480_v10 = vpop.f32.mrb[9].mxu0  ;;  %1745 = vmatmul.mubr.bf16.vlgmr.msra.gmra.mrb[16].mxu1 %v665_v3  ;;  %1785 = vmatmul.mubr.bf16.vlgmr.msra.gmra.mrb[20].mxu0 %v667_v4 }
 0x1c8   :  { %v440_v11 = vadd.f32 %v439_v9, %v147_v62  ;;  %v481_v12 = vadd.f32 %v480_v10, %v155_v63  ;;  %2313 = vmatpush3.bf16.msra.mxu1 %v2497_v1  ;;  %2335 = vmatpush3.bf16.msra.mxu0 %v2498_v2  ;;  %v441_v13 = vpop.f32.mrb[6].mxu1  ;;  %v482_v14 = vpop.f32.mrb[10].mxu0  ;;  %v143_v9 = vrot.slane %v2860_v35, %v142_v48  ;;  %v2538_v48 = vld [vmem:[%s3225_s5 + $0x290] sm:$0xff]  }
 0x1c9   :  { %v442_v17 = vpop.f32.mrb[7].mxu1  ;;  %v483_v18 = vpop.f32.mrb[11].mxu0  ;;  %2314 = vmatprep.subr.bf16.mxu1 %v2499_v5  ;;  %2336 = vmatprep.subr.bf16.mxu0 %v2500_v6  ;;  %v2517_v5 = vld [vmem:[%s3225_s5 + $0x128] sm:$0xff]   ;;  %v2520_v13 = vld [vmem:[%s3225_s5 + $0x1f0] sm:$0xff]   ;;  %v163_v14 = vrot.slane %v2848_v31, %v130_v36  ;;  %v2523_v36 = vld [vmem:[%s3225_s5 + $0x178] sm:$0xff]  }
 0x1ca   :  { %v654_v21 = vmax.f32 %v440_v11, 0.0  ;;  %v656_v22 = vmax.f32 %v481_v12, 0.0  ;;  %v2518_v6 = vld [vmem:[%s3225_s5 + $0x1a8] sm:$0xff]   ;;  %v2519_v12 = vld [vmem:[%s3225_s5 + $0x170] sm:$0xff]  }
 0x1cc   :  { %v670_v25 = vpack.c.bf16 %v654_v21, %v654_v21  ;;  %v672_v26 = vpack.c.bf16 %v656_v22, %v656_v22  ;;  %2315 = vmatpush3.bf16.msra.mxu1 %v2501_v15  ;;  %2337 = vmatpush3.bf16.msra.mxu0 %v2502_v16  ;;  %v2522_v15 = vld [vmem:[%s3225_s5 + $0x1b0] sm:$0xff]   ;;  %v438_v16 = vadd.f32 %v2892_v7, %v143_v9  ;;  %v2525_v7 = vld [vmem:[%s3225_s5 + $0x138] sm:$0xff]   ;;  %v2527_v22 = vld [vmem:[%s3225_s5 + $0x240] sm:$0xff]  }
 0x1cd   :  { %2316 = vmatprep.subr.bf16.mxu1 %v2503_v19  ;;  %2338 = vmatprep.subr.bf16.mxu0 %v2504_v20  ;;  %v187_v9 = vrot.slane %v2848_v31, %v154_v53  ;;  %v2557_v53 = vld [vmem:[%s3225_s5 + $0x238] sm:$0xff]  }
 0x1ce   :  { %v519_v38 = vpop.f32.mrb[8].mxu1  ;;  %v560_v39 = vpop.f32.mrb[12].mxu0  ;;  %1824 = vmatprep.mubr.bf16.mxu1 %v670_v25  ;;  %1864 = vmatprep.mubr.bf16.mxu0 %v672_v26  ;;  %v653_v20 = vmax.f32 %v438_v16, 0.0  ;;  %v2529_v26 = vld [vmem:[%s3225_s5 + $0x200] sm:$0xff]  }
 0x1cf   :  { %v2922_v40 = vadd.f32 %v519_v38, %v159_v23  ;;  %v2924_v41 = vadd.f32 %v560_v39, %v167_v24  ;;  %v521_v42 = vpop.f32.mrb[9].mxu1  ;;  %v562_v43 = vpop.f32.mrb[13].mxu0  ;;  %v2528_v23 = vld [vmem:[%s3225_s5 + $0x2c0] sm:$0xff]   ;;  %v2531_v38 = vld [vmem:[%s3225_s5 + $0x248] sm:$0xff]  }
 0x1d0   :  { %2317 = vmatpush3.bf16.msra.mxu1 %v2505_v27  ;;  %2339 = vmatpush3.bf16.msra.mxu0 %v2506_v28  ;;  %v523_v44 = vpop.f32.mrb[10].mxu1  ;;  %v564_v45 = vpop.f32.mrb[14].mxu0  ;;  %v522_v18 = vadd.f32 %v521_v42, %v163_v14  ;;  %v669_v27 = vpack.c.bf16 %v653_v20, %v653_v20  ;;  %v2532_v39 = vld [vmem:[%s3225_s5 + $0x2c8] sm:$0xff]   ;;  %v2559_v14 = vld [vmem:[%s3225_s5 + $0x340] sm:$0xff]   ;;  %v2568_v20 = vld [vmem:[%s3225_s5 + $0x3d0] sm:$0xff]  }
 0x1d1   :  { %v524_v49 = vpop.f32.mrb[11].mxu1  ;;  %v565_v50 = vpop.f32.mrb[15].mxu0  ;;  %2318 = vmatprep.subr.bf16.mxu1 %v2507_v33  ;;  %2340 = vmatprep.subr.bf16.mxu0 %v2508_v34  ;;  %v2530_v33 = vld [vmem:[%s3225_s5 + $0x280] sm:$0xff]   ;;  %v2534_v44 = vld [vmem:[%s3225_s5 + $0x288] sm:$0xff]   ;;  %v2535_v45 = vld [vmem:[%s3225_s5 + $0x250] sm:$0xff]  }
 0x1d2   :  { %v658_v24 = vmax.f32 %v522_v18, 0.0  ;;  %v2539_v49 = vld [vmem:[%s3225_s5 + $0x258] sm:$0xff]   ;;  %v2562_v16 = vld [vmem:[%s3225_s5 + $0x380] sm:$0xff]  }
 0x1d3   :  { %v2540_v50 = vld [vmem:[%s3225_s5 + $0x2d8] sm:$0xff]  }
 0x1d4   :  { %2319 = vmatpush3.bf16.msra.mxu1 %v2509_v46  ;;  %2341 = vmatpush3.bf16.msra.mxu0 %v2510_v47  ;;  %v674_v34 = vpack.c.bf16 %v658_v24, %v658_v24  ;;  %v2536_v46 = vld [vmem:[%s3225_s5 + $0x2d0] sm:$0xff]   ;;  %v2572_v24 = vld [vmem:[%s3225_s5 + $0x3d8] sm:$0xff]  }
 0x1d5   :  { %2320 = vmatprep.subr.bf16.mxu1 %v2511_v51  ;;  %2342 = vmatprep.subr.bf16.mxu0 %v2512_v54  ;;  %v2537_v47 = vld [vmem:[%s3225_s5 + $0x210] sm:$0xff]   ;;  %v2541_v51 = vld [vmem:[%s3225_s5 + $0x218] sm:$0xff]  }
 0x1d6   :  { %v601_v60 = vpop.f32.mrb[12].mxu1  ;;  %v642_v61 = vpop.f32.mrb[16].mxu0  ;;  %v2542_v54 = vld [vmem:[%s3225_s5 + $0x298] sm:$0xff]  }
 0x1d7   :  { %v2952_v62 = vadd.f32 %v601_v60, %v175_v55  ;;  %v2955_v63 = vadd.f32 %v642_v61, %v2853_v32  ;;  %v2957_v1 = vpop.f32.mrb[13].mxu1  ;;  %v2959_v2 = vpop.f32.mrb[17].mxu0  ;;  %v151_v32 = vrot.slane %v2860_v35, %v150_v30  ;;  %v171_v30 = vrot.slane %v2848_v31, %v138_v37  ;;  %v2521_v35 = vld [vmem:[%s3225_s5 + $0x130] sm:$0xff]   ;;  %v2524_v37 = vld [vmem:[%s3225_s5 + $0x1f8] sm:$0xff]   ;;  %v2543_v55 = vld [vmem:[%s3225_s5 + $0x260] sm:$0xff]  }
 0x1d8   :  { %2321 = vmatpush3.bf16.msra.mxu1 %v2513_v56  ;;  %2343 = vmatpush3.bf16.msra.mxu0 %v2514_v57  ;;  %v605_v3 = vpop.f32.mrb[14].mxu1  ;;  %v646_v4 = vpop.f32.mrb[18].mxu0  ;;  %v2544_v56 = vld [vmem:[%s3225_s5 + $0x2e0] sm:$0xff]   ;;  %v2548_v60 = vld [vmem:[%s3225_s5 + $0x2e8] sm:$0xff]  }
 0x1d9   :  { %v606_v10 = vpop.f32.mrb[15].mxu1  ;;  %v647_v11 = vpop.f32.mrb[19].mxu0  ;;  %2322 = vmatprep.subr.bf16.mxu1 %v2515_v58  ;;  %2344 = vmatprep.subr.bf16.mxu0 %v2516_v59  ;;  %v479_v17 = vadd.f32 %v2894_v8, %v151_v32  ;;  %v563_v19 = vadd.f32 %v562_v43, %v171_v30  ;;  %v2526_v8 = vld [vmem:[%s3225_s5 + $0x1b8] sm:$0xff]   ;;  %v2533_v43 = vld [vmem:[%s3225_s5 + $0x208] sm:$0xff]   ;;  %v2545_v57 = vld [vmem:[%s3225_s5 + $0x220] sm:$0xff]  }
 0x1da   :  { %v2546_v58 = vld [vmem:[%s3225_s5 + $0x2a0] sm:$0xff]   ;;  %v2547_v59 = vld [vmem:[%s3225_s5 + $0x268] sm:$0xff]   ;;  %v2551_v4 = vld [vmem:[%s3225_s5 + $0x270] sm:$0xff]  }
 0x1db   :  { %v655_v21 = vmax.f32 %v479_v17, 0.0  ;;  %v660_v25 = vmax.f32 %v563_v19, 0.0  ;;  %v2549_v61 = vld [vmem:[%s3225_s5 + $0x228] sm:$0xff]   ;;  %v2553_v32 = vld [vmem:[%s3225_s5 + $0x230] sm:$0xff]   ;;  %v2555_v11 = vld [vmem:[%s3225_s5 + $0x278] sm:$0xff]  }
 0x1dc   :  { %2323 = vmatpush3.bf16.msra.mxu1 %v2517_v5  ;;  %2345 = vmatpush3.bf16.msra.mxu0 %v2518_v6  ;;  %v2550_v3 = vld [vmem:[%s3225_s5 + $0x2a8] sm:$0xff]   ;;  %v2552_v5 = vld [vmem:[%s3225_s5 + $0x2f0] sm:$0xff]   ;;  %v179_v6 = vrot.slane %v2848_v31, %v146_v52  ;;  %v645_v52 = vadd.f32 %v2959_v2, %v187_v9  ;;  %v2560_v2 = vld [vmem:[%s3225_s5 + $0x3c0] sm:$0xff]  }
 0x1dd   :  { %2324 = vmatprep.subr.bf16.mxu1 %v2519_v12  ;;  %2346 = vmatprep.subr.bf16.mxu0 %v2520_v13  ;;  %v671_v28 = vpack.c.bf16 %v655_v21, %v655_v21  ;;  %v676_v42 = vpack.c.bf16 %v660_v25, %v660_v25  ;;  %v2554_v10 = vld [vmem:[%s3225_s5 + $0x2b0] sm:$0xff]   ;;  %v657_v12 = vmax.f32 %v2922_v40, 0.0  ;;  %v2558_v13 = vld [vmem:[%s3225_s5 + $0x2b8] sm:$0xff]   ;;  %v2561_v40 = vld [vmem:[%s3225_s5 + $0x300] sm:$0xff]  }
 0x1de   :  { %v604_v31 = vadd.f32 %v2957_v1, %v179_v6  ;;  %v659_v1 = vmax.f32 %v2924_v41, 0.0  ;;  %v2563_v17 = vld [vmem:[%s3225_s5 + $0x348] sm:$0xff]   ;;  %v2569_v21 = vld [vmem:[%s3225_s5 + $0x310] sm:$0xff]   ;;  %v2573_v25 = vld [vmem:[%s3225_s5 + $0x318] sm:$0xff]  }
 0x1df   :  { %v2565_v19 = vld [vmem:[%s3225_s5 + $0x308] sm:$0xff]  }
 0x1e0   :  { %2325 = vmatpush3.bf16.msra.mxu1 %v2521_v35  ;;  %2347 = vmatpush3.bf16.msra.mxu0 %v2522_v15  ;;  %v662_v30 = vmax.f32 %v604_v31, 0.0  ;;  %v664_v35 = vmax.f32 %v645_v52, 0.0  ;;  %v673_v15 = vpack.c.bf16 %v657_v12, %v657_v12  ;;  %v675_v41 = vpack.c.bf16 %v659_v1, %v659_v1 }
 0x1e1   :  { %2326 = vmatprep.subr.bf16.mxu1 %v2523_v36  ;;  %2348 = vmatprep.subr.bf16.mxu0 %v2524_v37  ;;  %v2564_v37 = vld [vmem:[%s3225_s5 + $0x3c8] sm:$0xff]  }
 0x1e2   :  { %v678_v36 = vpack.c.bf16 %v662_v30, %v662_v30  ;;  %v680_v18 = vpack.c.bf16 %v664_v35, %v664_v35 }
 0x1e4   :  { %2327 = vmatpush3.bf16.msra.mxu1 %v2525_v7  ;;  %2349 = vmatpush3.bf16.msra.mxu0 %v2526_v8  ;;  %v2566_v7 = vld [vmem:[%s3225_s5 + $0x388] sm:$0xff]   ;;  %v2567_v8 = vld [vmem:[%s3225_s5 + $0x350] sm:$0xff]  }
 0x1e5   :  { %2356 = vmatprep.subr.bf16.mxu1 %v2527_v22  ;;  %2378 = vmatprep.subr.bf16.mxu0 %v2528_v23  ;;  %v2570_v22 = vld [vmem:[%s3225_s5 + $0x390] sm:$0xff]   ;;  %v2571_v23 = vld [vmem:[%s3225_s5 + $0x358] sm:$0xff]  }
 0x1e7   :  { %1825 = vmatmul.mubr.bf16.vlgmr.msra.gmra.mrb[20].mxu1 %v669_v27  ;;  %1865 = vmatmul.mubr.bf16.vlgmr.msra.gmra.mrb[24].mxu0 %v671_v28  ;;  %v2575_v27 = vld [vmem:[%s3225_s5 + $0x360] sm:$0xff]  }
 0x1e8   :  { %2357 = vmatpush3.bf16.msra.mxu1 %v2529_v26  ;;  %1904 = vmatprep.mubr.bf16.mxu1 %v674_v34  ;;  %v2574_v26 = vld [vmem:[%s3225_s5 + $0x398] sm:$0xff]   ;;  %v2576_v28 = vld [vmem:[%s3225_s5 + $0x3e0] sm:$0xff]  }
 0x1e9   :  { %2379 = vmatpush3.bf16.msra.mxu0 %v2530_v33  ;;  %1944 = vmatprep.mubr.bf16.mxu0 %v676_v42  ;;  %v2577_v33 = vld [vmem:[%s3225_s5 + $0x320] sm:$0xff]   ;;  %v2581_v42 = vld [vmem:[%s3225_s5 + $0x328] sm:$0xff]  }
 0x1ea   :  { %2358 = vmatprep.subr.bf16.mxu1 %v2531_v38  ;;  %2380 = vmatprep.subr.bf16.mxu0 %v2532_v39  ;;  %v2578_v34 = vld [vmem:[%s3225_s5 + $0x3a0] sm:$0xff]   ;;  %v2579_v38 = vld [vmem:[%s3225_s5 + $0x368] sm:$0xff]  }
 0x1eb   :  { %v2580_v39 = vld [vmem:[%s3225_s5 + $0x3e8] sm:$0xff]  }
 0x1ec   :  { %2359 = vmatpush3.bf16.msra.mxu1 %v2533_v43  ;;  %v2582_v43 = vld [vmem:[%s3225_s5 + $0x3a8] sm:$0xff]  }
 0x1ed   :  { %2381 = vmatpush3.bf16.msra.mxu0 %v2534_v44  ;;  %2360 = vmatprep.subr.bf16.mxu1 %v2535_v45  ;;  %v2583_v44 = vld [vmem:[%s3225_s5 + $0x370] sm:$0xff]  }
 0x1ee   :  { %2382 = vmatprep.subr.bf16.mxu0 %v2536_v46  ;;  %v2584_v45 = vld [vmem:[%s3225_s5 + $0x3f0] sm:$0xff]  }
 0x1ef   :  { %v2585_v46 = vld [vmem:[%s3225_s5 + $0x330] sm:$0xff]  }
 0x1f0   :  { %2361 = vmatpush3.bf16.msra.mxu1 %v2537_v47  ;;  %v2586_v47 = vld [vmem:[%s3225_s5 + $0x3b0] sm:$0xff]  }
 0x1f1   :  { %2383 = vmatpush3.bf16.msra.mxu0 %v2538_v48  ;;  %2362 = vmatprep.subr.bf16.mxu1 %v2539_v49  ;;  %v2587_v48 = vld [vmem:[%s3225_s5 + $0x378] sm:$0xff]  }
 0x1f2   :  { %2384 = vmatprep.subr.bf16.mxu0 %v2540_v50  ;;  %v2588_v49 = vld [vmem:[%s3225_s5 + $0x3f8] sm:$0xff]  }
 0x1f3   :  { %v2589_v50 = vld [vmem:[%s3225_s5 + $0x338] sm:$0xff]  }
 0x1f4   :  { %2363 = vmatpush3.bf16.msra.mxu1 %v2541_v51  ;;  %v661_v51 = vmax.f32 %v2952_v62, 0.0  ;;  %v2591_v62 = vld [vmem:[%s3228_s7] sm:$0xff]  }
 0x1f5   :  { %2385 = vmatpush3.bf16.msra.mxu0 %v2542_v54  ;;  %2364 = vmatprep.subr.bf16.mxu1 %v2543_v55  ;;  %v2590_v54 = vld [vmem:[%s3225_s5 + $0x3b8] sm:$0xff]   ;;  %v663_v55 = vmax.f32 %v2955_v63, 0.0  ;;  %v14_v63 = vstv %s3229_s8 }
 0x1f6   :  { %2386 = vmatprep.subr.bf16.mxu0 %v2544_v56  ;;  %v677_v56 = vpack.c.bf16 %v661_v51, %v661_v51  ;;  %15 = vst [vmem:[#allocation2] sm:$0x1] %v14_v63 }
 0x1f8   :  { %2365 = vmatpush3.bf16.msra.mxu1 %v2545_v57  ;;  %v679_v57 = vpack.c.bf16 %v663_v55, %v663_v55 }
 0x1f9   :  { %2387 = vmatpush3.bf16.msra.mxu0 %v2546_v58  ;;  %2366 = vmatprep.subr.bf16.mxu1 %v2547_v59 }
 0x1fa   :  { %2388 = vmatprep.subr.bf16.mxu0 %v2548_v60  ;;  %v2134_v60 = vld [vmem:[%s3230_s6] ss:$0 sm:$0xff] }
 0x1fc   :  { %2367 = vmatpush3.bf16.msra.mxu1 %v2549_v61 }
 0x1fd   :  { %2389 = vmatpush3.bf16.msra.mxu0 %v2550_v3  ;;  %2368 = vmatprep.subr.bf16.mxu1 %v2551_v4 }
 0x1fe   :  { %2390 = vmatprep.subr.bf16.mxu0 %v2552_v5 }
 0x200   :  { %2369 = vmatpush3.bf16.msra.mxu1 %v2553_v32 }
 0x201   :  { %2391 = vmatpush3.bf16.msra.mxu0 %v2554_v10  ;;  %2370 = vmatprep.subr.bf16.mxu1 %v2555_v11 }
 0x202   :  { %2392 = vmatprep.subr.bf16.mxu0 %v2556_v29 }
 0x204   :  { %2371 = vmatpush3.bf16.msra.mxu1 %v2557_v53 }
 0x205   :  { %2393 = vmatpush3.bf16.msra.mxu0 %v2558_v13  ;;  %2400 = vmatprep.subr.bf16.mxu1 %v2559_v14 }
 0x206   :  { %2422 = vmatprep.subr.bf16.mxu0 %v2560_v2 }
 0x207   :  { %1905 = vmatmul.mubr.bf16.vlgmr.msra.gmra.mrb[24].mxu1 %v673_v15 }
 0x208   :  { %1945 = vmatmul.mubr.bf16.vlgmr.msra.gmra.mrb[28].mxu0 %v675_v41  ;;  %2401 = vmatpush3.bf16.msra.mxu1 %v2561_v40 }
 0x209   :  { %1984 = vmatprep.mubr.bf16.mxu1 %v678_v36  ;;  %2423 = vmatpush3.bf16.msra.mxu0 %v2562_v16 }
 0x20a   :  { %2024 = vmatprep.mubr.bf16.mxu0 %v680_v18  ;;  %2402 = vmatprep.subr.bf16.mxu1 %v2563_v17 }
 0x20b   :  { %2424 = vmatprep.subr.bf16.mxu0 %v2564_v37 }
 0x20c   :  { %2403 = vmatpush3.bf16.msra.mxu1 %v2565_v19 }
 0x20d   :  { %2425 = vmatpush3.bf16.msra.mxu0 %v2566_v7  ;;  %2404 = vmatprep.subr.bf16.mxu1 %v2567_v8 }
 0x20e   :  { %2426 = vmatprep.subr.bf16.mxu0 %v2568_v20 }
 0x210   :  { %2405 = vmatpush3.bf16.msra.mxu1 %v2569_v21 }
 0x211   :  { %2427 = vmatpush3.bf16.msra.mxu0 %v2570_v22  ;;  %2406 = vmatprep.subr.bf16.mxu1 %v2571_v23 }
 0x212   :  { %2428 = vmatprep.subr.bf16.mxu0 %v2572_v24 }
 0x214   :  { %2407 = vmatpush3.bf16.msra.mxu1 %v2573_v25 }
 0x215   :  { %2429 = vmatpush3.bf16.msra.mxu0 %v2574_v26  ;;  %2408 = vmatprep.subr.bf16.mxu1 %v2575_v27 }
 0x216   :  { %2430 = vmatprep.subr.bf16.mxu0 %v2576_v28 }
 0x218   :  { %2409 = vmatpush3.bf16.msra.mxu1 %v2577_v33 }
 0x219   :  { %2431 = vmatpush3.bf16.msra.mxu0 %v2578_v34  ;;  %2410 = vmatprep.subr.bf16.mxu1 %v2579_v38 }
 0x21a   :  { %2432 = vmatprep.subr.bf16.mxu0 %v2580_v39 }
 0x21c   :  { %2411 = vmatpush3.bf16.msra.mxu1 %v2581_v42 }
 0x21d   :  { %2433 = vmatpush3.bf16.msra.mxu0 %v2582_v43  ;;  %2412 = vmatprep.subr.bf16.mxu1 %v2583_v44 }
 0x21e   :  { %2434 = vmatprep.subr.bf16.mxu0 %v2584_v45  ;;  %v2263_v45 = vld [vmem:[#allocation2] ss:$0 sm:$0xff] }
 0x220   :  { %2413 = vmatpush3.bf16.msra.mxu1 %v2585_v46 }
 0x221   :  { %2435 = vmatpush3.bf16.msra.mxu0 %v2586_v47  ;;  %2414 = vmatprep.subr.bf16.mxu1 %v2587_v48 }
 0x222   :  { %2436 = vmatprep.subr.bf16.mxu0 %v2588_v49 }
 0x224   :  { %2415 = vmatpush3.bf16.msra.mxu1 %v2589_v50 }
 0x225   :  { %2437 = vmatpush3.bf16.msra.mxu0 %v2590_v54  ;;  %2452 = vmatprep.subr.bf16.mxu1 %v2594_v0 }
 0x227   :  { %1985 = vmatmul.mubr.bf16.vlgmr.msra.gmra.mrb[28].mxu1 %v677_v56 }
 0x228   :  { %2025 = vmatmul.mubr.bf16.vlgmr.msra.gmra.mrb[32].mxu0 %v679_v57  ;;  %2454 = vmatprep.mubr.msk.bf16.mxu1 %vm2596_vm2, %v2594_v0 }
 0x229   :  { %2453 = vmatpush3.bf16.msra.mxu1 %v2591_v62 }
 0x29a   :  { %v2284_v58 = vpop.f32.mrb[16].mxu1  ;;  %v2306_v59 = vpop.f32.mrb[20].mxu0 }
 0x29b   :  { %v2285_v61 = vpop.f32.mrb[17].mxu1  ;;  %v2307_v3 = vpop.f32.mrb[21].mxu0 }
 0x29c   :  { %v2286_v4 = vadd.f32 %v2285_v61, %v2284_v58  ;;  %v2308_v0 = vadd.f32 %v2307_v3, %v2306_v59  ;;  %v2287_v5 = vpop.f32.mrb[18].mxu1  ;;  %v2309_v6 = vpop.f32.mrb[22].mxu0 }
 0x29d   :  { %v2288_v9 = vpop.f32.mrb[19].mxu1  ;;  %v2310_v32 = vpop.f32.mrb[23].mxu0 }
 0x29e   :  { %v1747_v10 = vadd.f32 %v2286_v4, %v2134_v60 }
 0x2a0   :  { %v1787_v11 = vadd.f32 %v2308_v0, %v1747_v10 }
 0x2ba   :  { %v2328_v29 = vpop.f32.mrb[20].mxu1  ;;  %v2350_v31 = vpop.f32.mrb[24].mxu0 }
 0x2bb   :  { %v2329_v52 = vpop.f32.mrb[21].mxu1  ;;  %v2351_v53 = vpop.f32.mrb[25].mxu0 }
 0x2bc   :  { %v2330_v12 = vadd.f32 %v2329_v52, %v2328_v29  ;;  %v2352_v13 = vadd.f32 %v2351_v53, %v2350_v31  ;;  %v2331_v14 = vpop.f32.mrb[22].mxu1  ;;  %v2353_v1 = vpop.f32.mrb[26].mxu0 }
 0x2bd   :  { %v2332_v2 = vpop.f32.mrb[23].mxu1  ;;  %v2354_v30 = vpop.f32.mrb[27].mxu0 }
 0x2be   :  { %v1827_v35 = vadd.f32 %v2330_v12, %v1787_v11 }
 0x2c0   :  { %v1867_v40 = vadd.f32 %v2352_v13, %v1827_v35 }
 0x2da   :  { %v2372_v15 = vpop.f32.mrb[24].mxu1 }
 0x2db   :  { %v2394_v16 = vpop.f32.mrb[28].mxu0  ;;  %v2373_v41 = vpop.f32.mrb[25].mxu1 }
 0x2dc   :  { %v2374_v17 = vadd.f32 %v2373_v41, %v2372_v15  ;;  %v2395_v36 = vpop.f32.mrb[29].mxu0  ;;  %v2375_v37 = vpop.f32.mrb[26].mxu1 }
 0x2dd   :  { %v2396_v18 = vadd.f32 %v2395_v36, %v2394_v16  ;;  %v2397_v19 = vpop.f32.mrb[30].mxu0  ;;  %v2376_v7 = vpop.f32.mrb[27].mxu1 }
 0x2de   :  { %v1907_v8 = vadd.f32 %v2374_v17, %v1867_v40  ;;  %v2398_v20 = vpop.f32.mrb[31].mxu0 }
 0x2e0   :  { %v1947_v21 = vadd.f32 %v2396_v18, %v1907_v8 }
 0x2fa   :  { %v2416_v22 = vpop.f32.mrb[28].mxu1 }
 0x2fb   :  { %v2438_v23 = vpop.f32.mrb[32].mxu0  ;;  %v2417_v24 = vpop.f32.mrb[29].mxu1 }
 0x2fc   :  { %v2418_v25 = vadd.f32 %v2417_v24, %v2416_v22  ;;  %v2439_v26 = vpop.f32.mrb[33].mxu0  ;;  %v2419_v27 = vpop.f32.mrb[30].mxu1 }
 0x2fd   :  { %v2440_v28 = vadd.f32 %v2439_v26, %v2438_v23  ;;  %v2441_v33 = vpop.f32.mrb[34].mxu0  ;;  %v2420_v34 = vpop.f32.mrb[31].mxu1 }
 0x2fe   :  { %v1987_v38 = vadd.f32 %v2418_v25, %v1947_v21  ;;  %v2442_v39 = vpop.f32.mrb[35].mxu0 }
 0x300   :  { %v2027_v42 = vadd.f32 %v2440_v28, %v1987_v38 }
 0x302   :  { %v2032_v43 = vmax.f32 %v2027_v42, 0.0 }
 0x304   :  { %v2033_v44 = vpack.c.bf16 %v2032_v43, %v2032_v43 }
 0x306   :  { %2455 = vmatmul.mubr.msk.bf16.vlgmr.msra.gmra.mrb[32].mxu1 %vm2049_vm6, %v2033_v44 }
 0x3d9   :  { %v2087_v46 = vpop.f32.mrb[32].mxu1 }
 0x3da   :  { %v2088_v47 = vadd.f32 %v2263_v45, %v2087_v46  ;;  %v2456_v48 = vpop.f32.mrb[33].mxu1 }
 0x3db   :  { %v2090_v49 = vpop.f32.mrb[34].mxu1 }
 0x3dc   :  { %2094 = vst.msk [vmem:[%s3231_s9] sm:$0xff] %vm2093_vm7, %v2088_v47  ;;  %v2457_v50 = vpop.f32.mrb[35].mxu1 }

</bundles_post_ra>
